<compile_context>
chip_gen: v7x
topology: tpu7x:2x2x1
jax: 0.10.0
libtpu: 0.0.40
codegen_flags: <defaults>
</compile_context>

<pallas_src>
import functools

import jax
import jax.numpy as jnp
from jax.experimental import pallas as pl
from jax.experimental.pallas import tpu as pltpu

LANES = 128
SUBLANES = 32           # lcm of min sublane tiles (f32:8, bf16:16, int8/bool:32)
MAX_BLOCK_ROWS = 8192   # (8192,128) f32 tile = 4 MiB; 2 inputs x 2 bufs = 16 MiB
SUB_ROWS = 256          # in-kernel sub-chunk (8 vregs per streamed array)
NUM_SPLITS = 2          # leading "parallel" grid axis (v7x dual TensorCore)
NUM_STATS = 5           # inter, sum(p), sum(t), sum(t*log xc), sum((1-t)*log(1-xc))


def _round_up(x, m):
    return ((x + m - 1) // m) * m


def _combo_stats_kernel(x_ref, t_ref, out_ref, *, block_rows, eps, binary_targets):
    """Accumulates the five ComboLoss partial sums for one stream of row-blocks.

    x_ref, t_ref : (block_rows, 128) VMEM tiles (native dtype, cast in-kernel)
    out_ref      : (1, NUM_STATS*8, 128) VMEM accumulator block, resident
                   across the reduction ("arbitrary") grid axis.
    """
    step = pl.program_id(1)

    @pl.when(step == 0)
    def _():
        out_ref[...] = jnp.zeros_like(out_ref)

    lo = jnp.float32(eps)
    hi = jnp.float32(1.0 - eps)   # rounds to 1.0 in f32 for eps=1e-9, same as ref

    def fold(v):
        # (r,128) -> (8,128): pure chain of vreg adds (no cross-lane work).
        return v.reshape(-1, 8, LANES).sum(axis=0)

    def chunk_update(carry, row0, nrows):
        xf = x_ref[row0:row0 + nrows, :].astype(jnp.float32)
        tf = t_ref[row0:row0 + nrows, :].astype(jnp.float32)
        # sigmoid via a single tanh EUP push (mathematically == sigmoid).
        p = 0.5 * jnp.tanh(0.5 * xf) + 0.5
        xc = jnp.clip(xf, lo, hi)
        if binary_targets:
            # Binary-target fast path: one log per element instead of two.
            pos = tf > 0.5
            lg = jnp.log(jnp.where(pos, xc, 1.0 - xc))
            zero = jnp.zeros_like(lg)
            a1 = jnp.where(pos, lg, zero)          # == t * log(xc)      for t in {0,1}
            a2 = jnp.where(pos, zero, lg)          # == (1-t)*log(1-xc)  for t in {0,1}
        else:
            a1 = tf * jnp.log(xc)
            a2 = (1.0 - tf) * jnp.log(1.0 - xc)
        stats = (fold(p * tf), fold(p), fold(tf), fold(a1), fold(a2))
        return tuple(c + s for c, s in zip(carry, stats))

    carry = (jnp.zeros((8, LANES), jnp.float32),) * NUM_STATS
    n_full, rem = divmod(block_rows, SUB_ROWS)
    for j in range(n_full):                # static offsets, fully unrolled
        carry = chunk_update(carry, j * SUB_ROWS, SUB_ROWS)
    if rem:
        carry = chunk_update(carry, n_full * SUB_ROWS, rem)

    # Touch the VMEM accumulators once per grid step.
    for k in range(NUM_STATS):
        out_ref[0, k * 8:(k + 1) * 8, :] += carry[k]


def combo_loss(inputs, targets, smooth=1.0, alpha=0.5, ce_ratio=0.5,
               eps=1e-9, assume_binary_targets=False):
    """Pallas TPU implementation of ComboLoss.forward (scalar f32 result)."""
    assert inputs.shape == targets.shape
    n = int(inputs.size)
    assert n > 0

    # Lane-dense (rows, 128) view of the flattened arrays, zero-padded up to a
    # whole number of equal blocks so the kernel needs no per-step validity
    # mask; the known pad contributions are removed analytically below.
    rows = pl.cdiv(n, LANES)
    nblocks = _round_up(max(pl.cdiv(rows, MAX_BLOCK_ROWS), 1), NUM_SPLITS)
    block_rows = _round_up(pl.cdiv(rows, nblocks), SUBLANES)
    padded_rows = nblocks * block_rows
    steps = nblocks // NUM_SPLITS
    n_pad = padded_rows * LANES - n

    x = inputs.reshape(-1)
    t = targets.reshape(-1)
    if n_pad:
        x = jnp.pad(x, (0, n_pad))
        t = jnp.pad(t, (0, n_pad))
    x2 = x.reshape(padded_rows, LANES)
    t2 = t.reshape(padded_rows, LANES)

    kernel = functools.partial(
        _combo_stats_kernel, block_rows=block_rows, eps=float(eps),
        binary_targets=bool(assume_binary_targets))

    in_spec = pl.BlockSpec((block_rows, LANES), lambda c, i: (c * steps + i, 0))
    partial_sums = pl.pallas_call(
        kernel,
        out_shape=jax.ShapeDtypeStruct((NUM_SPLITS, NUM_STATS * 8, LANES),
                                       jnp.float32),
        grid_spec=pltpu.PrefetchScalarGridSpec(
            num_scalar_prefetch=0,
            grid=(NUM_SPLITS, steps),
            in_specs=[in_spec, in_spec],
            out_specs=pl.BlockSpec((1, NUM_STATS * 8, LANES),
                                   lambda c, i: (c, 0, 0)),
        ),
        compiler_params=pltpu.CompilerParams(
            dimension_semantics=("parallel", "arbitrary"),
            vmem_limit_bytes=32 * 1024 * 1024,
        ),
    )(x2, t2)

    # Tiny final combine (a few hundred f32 ops) in plain JAX.
    sums = jnp.sum(
        partial_sums.reshape(NUM_SPLITS, NUM_STATS, 8, LANES), axis=(0, 2, 3))
    inter_s, p_s, t_s, a1_s, a2_s = (sums[k] for k in range(NUM_STATS))
    if n_pad:
        # Pad elements are x=0, t=0: sigmoid(0)=0.5 goes into sum(p) and
        # log(1 - clip(0,eps,1-eps)) goes into the (1-t)*log(1-xc) accumulator.
        p_s = p_s - 0.5 * jnp.float32(n_pad)
        a2_s = a2_s - jnp.float32(n_pad) * jnp.log(
            jnp.float32(1.0) - jnp.float32(eps))

    smooth = jnp.float32(smooth)
    alpha = jnp.float32(alpha)
    ce_ratio = jnp.float32(ce_ratio)
    dice = 1.0 - (2.0 * inter_s + smooth) / (p_s + t_s + smooth)
    weighted_ce = -(alpha * (a1_s + (1.0 - alpha) * a2_s)) / jnp.float32(n)
    return ce_ratio * weighted_ce - (1.0 - ce_ratio) * dice


def combo_loss_ref(inputs, targets, smooth=1.0, alpha=0.5, ce_ratio=0.5,
                   eps=1e-9):
    """Pure-JAX reference matching the PyTorch ComboLoss.forward."""
    x = inputs.reshape(-1).astype(jnp.float32)
    t = targets.reshape(-1).astype(jnp.float32)
    p = jax.nn.sigmoid(x)
    inter = jnp.sum(p * t)
    dice = 1.0 - (2.0 * inter + smooth) / (jnp.sum(p) + jnp.sum(t) + smooth)
    xc = jnp.clip(x, eps, 1.0 - eps)
    ce = -(alpha * (t * jnp.log(xc)
                    + (1.0 - alpha) * (1.0 - t) * jnp.log(1.0 - xc)))
    return ce_ratio * jnp.mean(ce) - (1.0 - ce_ratio) * dice


if __name__ == "__main__":
    key = jax.random.PRNGKey(0)
    k1, k2, k3, k4 = jax.random.split(key, 4)

    # (B, C, H, W) predicted foreground probabilities and binary masks.  The
    # reference's CE term clamps the RAW inputs to [eps, 1-eps] (it expects
    # probabilities); values >= 1 make the reference itself NaN, so the
    # example inputs live strictly inside (0, 1).
    B, C, H, W = 2, 4, 16, 16
    inputs = jax.random.uniform(k1, (B, C, H, W), dtype=jnp.float32,
                                minval=0.02, maxval=0.98)
    targets = (jax.random.uniform(k2, (B, C, H, W)) > 0.5).astype(jnp.float32)

    out = jax.block_until_ready(combo_loss(inputs, targets))
    ref = jax.block_until_ready(combo_loss_ref(inputs, targets))
    assert jnp.allclose(out, ref, atol=1e-4, rtol=1e-4), (out, ref)

    # Binary-target fast path (one log per element) on the same data.
    out_bin = jax.block_until_ready(
        combo_loss(inputs, targets, assume_binary_targets=True))
    assert jnp.allclose(out_bin, ref, atol=1e-4, rtol=1e-4), (out_bin, ref)

    # Slightly larger, non-aligned shape: exercises the zero-pad correction
    # and the unrolled multi-chunk inner loop.
    B2, C2, H2, W2 = 2, 4, 130, 130
    inputs2 = jax.random.uniform(k3, (B2, C2, H2, W2), dtype=jnp.float32,
                                 minval=0.02, maxval=0.98)
    targets2 = (jax.random.uniform(k4, (B2, C2, H2, W2)) > 0.5).astype(jnp.float32)
    out2 = jax.block_until_ready(combo_loss(inputs2, targets2))
    ref2 = jax.block_until_ready(combo_loss_ref(inputs2, targets2))
    assert jnp.allclose(out2, ref2, atol=1e-4, rtol=1e-4), (out2, ref2)

    print("KERNEL_OK")
</pallas_src>

<mosaic_0001>
module attributes {stable_mosaic.version = 11 : i64} {
  func.func @_combo_stats_kernel(%arg0: i32, %arg1: i32, %arg2: memref<32x128xf32, #tpu.memory_space<vmem>>, %arg3: memref<32x128xf32, #tpu.memory_space<vmem>>, %arg4: memref<1x40x128xf32, #tpu.memory_space<vmem>>) attributes {dimension_semantics = [#tpu.dimension_semantics<parallel>, #tpu.dimension_semantics<arbitrary>], iteration_bounds = array<i64: 2, 1>, scalar_prefetch = 0 : i64, scratch_operands = 0 : i64, tpu.core_type = #tpu.core_type<tc>, window_params = [{transform_indices = @transform_0, window_bounds = array<i64: 32, 128>}, {transform_indices = @transform_1, window_bounds = array<i64: 32, 128>}, {transform_indices = @transform_2, window_bounds = array<i64: 1, 40, 128>}]} {
    %c0_i32 = arith.constant 0 : i32
    %0 = arith.cmpi eq, %arg1, %c0_i32 : i32
    %1 = arith.extui %0 : i1 to i32
    %c0_i32_0 = arith.constant 0 : i32
    %2 = arith.cmpi ne, %1, %c0_i32_0 : i32
    scf.if %2 {
      %cst_42 = arith.constant 0.000000e+00 : f32
      %71 = vector.broadcast %cst_42 : f32 to vector<1x40x128xf32>
      %c0_43 = arith.constant 0 : index
      %c0_44 = arith.constant 0 : index
      %c0_45 = arith.constant 0 : index
      %72 = vector.load %arg4[%c0_43, %c0_44, %c0_45] : memref<1x40x128xf32, #tpu.memory_space<vmem>>, vector<1x40x128xf32>
      tpu.vector_store %arg4[%c0_43, %c0_44, %c0_45], %71 {strides = array<i32>} : memref<1x40x128xf32, #tpu.memory_space<vmem>>, vector<1x40x128xf32>,
    } else {
    }
    %cst = arith.constant 0.000000e+00 : f32
    %3 = vector.broadcast %cst : f32 to vector<8x128xf32>
    %c0 = arith.constant 0 : index
    %c0_1 = arith.constant 0 : index
    %4 = vector.load %arg2[%c0, %c0_1] : memref<32x128xf32, #tpu.memory_space<vmem>>, vector<32x128xf32>
    %c0_2 = arith.constant 0 : index
    %c0_3 = arith.constant 0 : index
    %5 = vector.load %arg3[%c0_2, %c0_3] : memref<32x128xf32, #tpu.memory_space<vmem>>, vector<32x128xf32>
    %cst_4 = arith.constant 5.000000e-01 : f32
    %6 = vector.broadcast %cst_4 : f32 to vector<32x128xf32>
    %7 = arith.mulf %6, %4 : vector<32x128xf32>
    %8 = math.tanh %7 : vector<32x128xf32>
    %cst_5 = arith.constant 5.000000e-01 : f32
    %9 = vector.broadcast %cst_5 : f32 to vector<32x128xf32>
    %10 = arith.mulf %9, %8 : vector<32x128xf32>
    %cst_6 = arith.constant 5.000000e-01 : f32
    %11 = vector.broadcast %cst_6 : f32 to vector<32x128xf32>
    %12 = arith.addf %10, %11 : vector<32x128xf32>
    %cst_7 = arith.constant 9.99999971E-10 : f32
    %cst_8 = arith.constant 1.000000e+00 : f32
    %13 = vector.broadcast %cst_7 : f32 to vector<32x128xf32>
    %14 = arith.maximumf %13, %4 : vector<32x128xf32>
    %15 = vector.broadcast %cst_8 : f32 to vector<32x128xf32>
    %16 = arith.minimumf %15, %14 : vector<32x128xf32>
    %17 = math.log %16 : vector<32x128xf32>
    %18 = arith.mulf %5, %17 : vector<32x128xf32>
    %cst_9 = arith.constant 1.000000e+00 : f32
    %19 = vector.broadcast %cst_9 : f32 to vector<32x128xf32>
    %20 = arith.subf %19, %5 : vector<32x128xf32>
    %cst_10 = arith.constant 1.000000e+00 : f32
    %21 = vector.broadcast %cst_10 : f32 to vector<32x128xf32>
    %22 = arith.subf %21, %16 : vector<32x128xf32>
    %23 = math.log %22 : vector<32x128xf32>
    %24 = arith.mulf %20, %23 : vector<32x128xf32>
    %25 = arith.mulf %12, %5 : vector<32x128xf32>
    %26 = vector.shape_cast %25 : vector<32x128xf32> to vector<4x8x128xf32>
    %cst_11 = arith.constant dense<0.000000e+00> : vector<8x128xf32>
    %27 = vector.multi_reduction <add>, %26, %cst_11 [0] : vector<4x8x128xf32> to vector<8x128xf32>
    %28 = vector.shape_cast %12 : vector<32x128xf32> to vector<4x8x128xf32>
    %cst_12 = arith.constant dense<0.000000e+00> : vector<8x128xf32>
    %29 = vector.multi_reduction <add>, %28, %cst_12 [0] : vector<4x8x128xf32> to vector<8x128xf32>
    %30 = vector.shape_cast %5 : vector<32x128xf32> to vector<4x8x128xf32>
    %cst_13 = arith.constant dense<0.000000e+00> : vector<8x128xf32>
    %31 = vector.multi_reduction <add>, %30, %cst_13 [0] : vector<4x8x128xf32> to vector<8x128xf32>
    %32 = vector.shape_cast %18 : vector<32x128xf32> to vector<4x8x128xf32>
    %cst_14 = arith.constant dense<0.000000e+00> : vector<8x128xf32>
    %33 = vector.multi_reduction <add>, %32, %cst_14 [0] : vector<4x8x128xf32> to vector<8x128xf32>
    %34 = vector.shape_cast %24 : vector<32x128xf32> to vector<4x8x128xf32>
    %cst_15 = arith.constant dense<0.000000e+00> : vector<8x128xf32>
    %35 = vector.multi_reduction <add>, %34, %cst_15 [0] : vector<4x8x128xf32> to vector<8x128xf32>
    %36 = arith.addf %3, %27 : vector<8x128xf32>
    %37 = arith.addf %3, %29 : vector<8x128xf32>
    %38 = arith.addf %3, %31 : vector<8x128xf32>
    %39 = arith.addf %3, %33 : vector<8x128xf32>
    %40 = arith.addf %3, %35 : vector<8x128xf32>
    %c0_16 = arith.constant 0 : index
    %c0_17 = arith.constant 0 : index
    %c0_18 = arith.constant 0 : index
    %41 = vector.load %arg4[%c0_16, %c0_17, %c0_18] : memref<1x40x128xf32, #tpu.memory_space<vmem>>, vector<1x8x128xf32>
    %42 = vector.shape_cast %41 : vector<1x8x128xf32> to vector<8x128xf32>
    %43 = arith.addf %42, %36 : vector<8x128xf32>
    %c0_19 = arith.constant 0 : index
    %c0_20 = arith.constant 0 : index
    %c0_21 = arith.constant 0 : index
    %44 = vector.load %arg4[%c0_19, %c0_20, %c0_21] : memref<1x40x128xf32, #tpu.memory_space<vmem>>, vector<1x8x128xf32>
    %45 = vector.shape_cast %44 : vector<1x8x128xf32> to vector<8x128xf32>
    %46 = vector.shape_cast %43 : vector<8x128xf32> to vector<1x8x128xf32>
    tpu.vector_store %arg4[%c0_19, %c0_20, %c0_21], %46 {strides = array<i32>} : memref<1x40x128xf32, #tpu.memory_space<vmem>>, vector<1x8x128xf32>,
    %c0_22 = arith.constant 0 : index
    %c8 = arith.constant 8 : index
    %c0_23 = arith.constant 0 : index
    %47 = vector.load %arg4[%c0_22, %c8, %c0_23] : memref<1x40x128xf32, #tpu.memory_space<vmem>>, vector<1x8x128xf32>
    %48 = vector.shape_cast %47 : vector<1x8x128xf32> to vector<8x128xf32>
    %49 = arith.addf %48, %37 : vector<8x128xf32>
    %c0_24 = arith.constant 0 : index
    %c8_25 = arith.constant 8 : index
    %c0_26 = arith.constant 0 : index
    %50 = vector.load %arg4[%c0_24, %c8_25, %c0_26] : memref<1x40x128xf32, #tpu.memory_space<vmem>>, vector<1x8x128xf32>
    %51 = vector.shape_cast %50 : vector<1x8x128xf32> to vector<8x128xf32>
    %52 = vector.shape_cast %49 : vector<8x128xf32> to vector<1x8x128xf32>
    tpu.vector_store %arg4[%c0_24, %c8_25, %c0_26], %52 {strides = array<i32>} : memref<1x40x128xf32, #tpu.memory_space<vmem>>, vector<1x8x128xf32>,
    %c0_27 = arith.constant 0 : index
    %c16 = arith.constant 16 : index
    %c0_28 = arith.constant 0 : index
    %53 = vector.load %arg4[%c0_27, %c16, %c0_28] : memref<1x40x128xf32, #tpu.memory_space<vmem>>, vector<1x8x128xf32>
    %54 = vector.shape_cast %53 : vector<1x8x128xf32> to vector<8x128xf32>
    %55 = arith.addf %54, %38 : vector<8x128xf32>
    %c0_29 = arith.constant 0 : index
    %c16_30 = arith.constant 16 : index
    %c0_31 = arith.constant 0 : index
    %56 = vector.load %arg4[%c0_29, %c16_30, %c0_31] : memref<1x40x128xf32, #tpu.memory_space<vmem>>, vector<1x8x128xf32>
    %57 = vector.shape_cast %56 : vector<1x8x128xf32> to vector<8x128xf32>
    %58 = vector.shape_cast %55 : vector<8x128xf32> to vector<1x8x128xf32>
    tpu.vector_store %arg4[%c0_29, %c16_30, %c0_31], %58 {strides = array<i32>} : memref<1x40x128xf32, #tpu.memory_space<vmem>>, vector<1x8x128xf32>,
    %c0_32 = arith.constant 0 : index
    %c24 = arith.constant 24 : index
    %c0_33 = arith.constant 0 : index
    %59 = vector.load %arg4[%c0_32, %c24, %c0_33] : memref<1x40x128xf32, #tpu.memory_space<vmem>>, vector<1x8x128xf32>
    %60 = vector.shape_cast %59 : vector<1x8x128xf32> to vector<8x128xf32>
    %61 = arith.addf %60, %39 : vector<8x128xf32>
    %c0_34 = arith.constant 0 : index
    %c24_35 = arith.constant 24 : index
    %c0_36 = arith.constant 0 : index
    %62 = vector.load %arg4[%c0_34, %c24_35, %c0_36] : memref<1x40x128xf32, #tpu.memory_space<vmem>>, vector<1x8x128xf32>
    %63 = vector.shape_cast %62 : vector<1x8x128xf32> to vector<8x128xf32>
    %64 = vector.shape_cast %61 : vector<8x128xf32> to vector<1x8x128xf32>
    tpu.vector_store %arg4[%c0_34, %c24_35, %c0_36], %64 {strides = array<i32>} : memref<1x40x128xf32, #tpu.memory_space<vmem>>, vector<1x8x128xf32>,
    %c0_37 = arith.constant 0 : index
    %c32 = arith.constant 32 : index
    %c0_38 = arith.constant 0 : index
    %65 = vector.load %arg4[%c0_37, %c32, %c0_38] : memref<1x40x128xf32, #tpu.memory_space<vmem>>, vector<1x8x128xf32>
    %66 = vector.shape_cast %65 : vector<1x8x128xf32> to vector<8x128xf32>
    %67 = arith.addf %66, %40 : vector<8x128xf32>
    %c0_39 = arith.constant 0 : index
    %c32_40 = arith.constant 32 : index
    %c0_41 = arith.constant 0 : index
    %68 = vector.load %arg4[%c0_39, %c32_40, %c0_41] : memref<1x40x128xf32, #tpu.memory_space<vmem>>, vector<1x8x128xf32>
    %69 = vector.shape_cast %68 : vector<1x8x128xf32> to vector<8x128xf32>
    %70 = vector.shape_cast %67 : vector<8x128xf32> to vector<1x8x128xf32>
    tpu.vector_store %arg4[%c0_39, %c32_40, %c0_41], %70 {strides = array<i32>} : memref<1x40x128xf32, #tpu.memory_space<vmem>>, vector<1x8x128xf32>,
    return
  }
  func.func @transform_0(%arg0: i32, %arg1: i32) -> (i32, i32) {
    %c1_i32 = arith.constant 1 : i32
    %0 = arith.muli %arg0, %c1_i32 : i32
    %1 = arith.addi %0, %arg1 : i32
    %c0_i32 = arith.constant 0 : i32
    %c0_i32_0 = arith.constant 0 : i32
    return %1, %c0_i32 : i32, i32
  }
  func.func @transform_1(%arg0: i32, %arg1: i32) -> (i32, i32) {
    %c1_i32 = arith.constant 1 : i32
    %0 = arith.muli %arg0, %c1_i32 : i32
    %1 = arith.addi %0, %arg1 : i32
    %c0_i32 = arith.constant 0 : i32
    %c0_i32_0 = arith.constant 0 : i32
    return %1, %c0_i32 : i32, i32
  }
  func.func @transform_2(%arg0: i32, %arg1: i32) -> (i32, i32, i32) {
    %c0_i32 = arith.constant 0 : i32
    %c0_i32_0 = arith.constant 0 : i32
    %c0_i32_1 = arith.constant 0 : i32
    return %arg0, %c0_i32, %c0_i32_0 : i32, i32, i32
  }
}

</mosaic_0001>

<bundles_post_ra>
// kernel: tpu_custom_call.1
= control target key start
LH: loop header
LB: loop body
LE: loop exit
PB: predicated region body
PF: predicated region fallthrough
CT: control target
= control target key end

     0   :  { %7 = vsyncpa [#allocation3], 0  ;;  %s1011_s0 = inlined_call_operand.hbm [shape: f32[64,128], index: 0, kind: input, shape index: {}]   ;;  %s1012_s1 = inlined_call_operand.hbm [shape: f32[64,128], index: 1, kind: input, shape index: {}]   ;;  %s1013_s2 = inlined_call_operand.hbm [shape: f32[2,40,128], index: 2, kind: output, shape index: {}]  }
   0x1   :  { %9 = vsyncpa [#allocation3 + $0x1], 0 }
   0x2   :  { %10 = vsyncpa [#allocation6], 0 }
   0x3   :  { %12 = vsyncpa [#allocation6 + $0x1], 0 }
   0x4   :  { %13 = vsyncpa [#allocation4], 0 }
   0x5   :  { %15 = vsyncpa [#allocation4 + $0x1], 0  ;;  %s742_s9 = smov 0   ;;  %s744_s10 = smov 0  }
   0x6   :  { %s746_s11 = smov 0   ;;  %s748_s12 = smov 0  }
   0x7   :  { %s750_s13 = smov 0   ;;  %s752_s14 = smov 0  }
   0x8 LB: > { %s456_s15 = sadd.s32 4294967295, %s718_s14   ;;  %s457_s16 = sadd.s32 4294967294, %s718_s14   ;;  %s718_s14 = sphi %s752_s14, %s21_s14   ;;  %s714_s13 = sphi %s750_s13, %s1031_s13   ;;  %s710_s12 = sphi %s748_s12, %s1030_s12   ;;  %s706_s11 = sphi %s746_s11, %s1029_s11   ;;  %s702_s10 = sphi %s744_s10, %s1028_s10   ;;  %s698_s9 = sphi %s742_s9, %s1027_s9  }
   0x9   : > { %s33_s17 = sadd.s32 1, %s714_s13  ;;  %s42_s18 = sadd.s32 1, %s706_s11 }
   0xa   : > { %p35_p0 = scmp.ge.s32.totalorder %s33_s17, 2  ;;  %p49_p1 = scmp.ne.s32.totalorder %s706_s11, %s702_s10 }
   0xb   : > { %p50_p2 = scmp.eq.s32.totalorder %s718_s14, 0  ;;  %p55_p3 = scmp.ne.s32.totalorder %s702_s10, %s698_s9 }
   0xc   : > { %s1033_s17 = smov (%p35_p0, %s33_s17), 0  ;;  %p56_p5 = scmp.eq.s32.totalorder %s456_s15, 0 }
   0xd   : > { %p783_p4 = por %p50_p2, %p49_p1  ;;  %s39_s20 = ssub.s32 %s714_s13, %s1033_s17 }
   0xe   : > { %p107_p6 = scmp.eq.s32.totalorder %s456_s15, 1  ;;  %p40_p7 = scmp.eq.s32.totalorder %s39_s20, 0 }
   0xf   : > { %p789_p8 = por %p56_p5, %p55_p3  ;;  %p113_p10 = scmp.eq.s32.totalorder %s457_s16, 1 }
  0x10   : > { %p793_p9 = por %p107_p6, %p49_p1  ;;  %p493_p13 = scmp.lt.s32.totalorder %s718_s14, 2 }
  0x11   : > { %s1017_s21 = scalar_select %p789_p8, 1, 0 }
  0x12   : > { %s1018_s22 = scalar_select %p793_p9, 1, 0 }
  0x13   : > { %s798_s23 = scalar_select %p40_p7, %s706_s11, %s42_s18  }
  0x14   : > { %p800_p11 = por %p113_p10, %p55_p3  ;;  %s807_s25 = sand.u32 1, %s706_s11  }
  0x15   : > { %s460_s26 = sshll.u32 %s807_s25, 5  ;;  %s472_s27 = sshll.u32 %s714_s13, 9 }
  0x16   : > { %s1019_s24 = scalar_select %p800_p11, 1, 0 }
  0x17   : > { %s816_s30 = scalar_lea.hbm %s1011_s0, %s472_s27  ;;  %s137_s3 = scalar_lea.vmem [#allocation2], %s460_s26 }
  0x18   : > { %s145_s4 = sshll.u32 %s137_s3, 4  ;;  %p824_p0 = pnand %p493_p13, %p783_p4  ;;  %s820_s4 = int_to_ptr.vmem [resolvable:$true] %s145_s4 }
  0x19   : > { %s134_s6 = scalar_lea.sflag [#allocation3], %s807_s25  ;;  %s572_s7 = scalar_lea.hbm %s816_s30, 512 }
  0x1a   : > { %p573_p2 = scmp.ne.s32.totalorder %s816_s30, %s572_s7  ;;  %p574_p3 = pneg %p824_p0 }
  0x1b   : > { %s577_s16 = scalar_lea.hbm %s1011_s0, 1024  ;;  %p578_p4 = scmp.lt.u32.totalorder %s816_s30, %s1011_s0 }
  0x1c   : > { %p575_p5 = pnand %p574_p3, %p573_p2  ;;  %p579_p7 = scmp.lt.u32.totalorder %s577_s16, %s572_s7 }
  0x1d   : > { %p581_p13 = scmp.lt.u32.totalorder %s572_s7, %s816_s30 }
  0x1e   : > { %p576_p6 = pneg %p575_p5  ;;  %p580_p10 = por %p579_p7, %p578_p4 }
  0x20   : > { %p582_p12 = por %p581_p13, %p580_p10 }
  0x22   : > { %p583_p1 = pnand %p582_p12, %p576_p6 }
  0x24   : > { %586 = shalt.err (!%p583_p1)
}
  0x25   : > { %s587_s20 = scalar_lea.vmem %s820_s4, 512  ;;  %s720_s28 = smov [#allocation2]  }
  0x26   : > { %p588_p2 = scmp.ne.s32.totalorder %s820_s4, %s587_s20  ;;  %s592_s29 = sshll.u32 %s720_s28, 4  ;;  %s593_s29 = int_to_ptr.vmem [resolvable:$false] %s592_s29 }
  0x27   : > { %s594_s3 = scalar_lea.vmem %s593_s29, 1024  ;;  %p595_p9 = scmp.lt.s32.totalorder %s820_s4, %s593_s29 }
  0x28   : > { %p590_p5 = pnand %p588_p2, %p574_p3  ;;  %p596_p4 = scmp.lt.s32.totalorder %s594_s3, %s587_s20 }
  0x2a   : > { %p591_p11 = pneg %p590_p5  ;;  %p597_p7 = por %p596_p4, %p595_p9 }
  0x2c   : > { %p598_p10 = pnand %p597_p7, %p591_p11 }
  0x2e   : > { %601 = shalt.err (!%p598_p10)
}
  0x2f   : > { %s721_s7 = smov 128   ;;  %s722_s8 = smov 8  }
  0x30   : > { %485 = dma.hbm_to_vmem [thread:$0]  (!%p824_p0), %s816_s30, 512, %s820_s4, %s134_s6, %s721_s7, %s721_s7, %s722_s8  }
  0x31   : > { %p175_p9 = scmp.lt.s32.totalorder %s718_s14, 3  ;;  %s866_s18 = scalar_lea.hbm %s1012_s1, %s472_s27 }
  0x32   : > { %p1021_p11 = scmp.ge.s32.totalorder %s718_s14, 1  ;;  %s159_s20 = scalar_lea.vmem [#allocation5], %s460_s26 }
  0x33   : > { %s167_s28 = sshll.u32 %s159_s20, 4  ;;  %s156_s30 = scalar_lea.sflag [#allocation6], %s807_s25  ;;  %s876_s28 = int_to_ptr.vmem [resolvable:$true] %s167_s28 }
  0x34   : > { %p870_p12 = pnand %p1021_p11, %p175_p9  ;;  %s602_s4 = scalar_lea.hbm %s866_s18, 512 }
  0x35   : > { %p603_p1 = scmp.ne.s32.totalorder %s866_s18, %s602_s4  ;;  %s607_s29 = scalar_lea.hbm %s1012_s1, 1024 }
  0x36   : > { %p608_p2 = scmp.lt.u32.totalorder %s866_s18, %s1012_s1  ;;  %p609_p5 = scmp.lt.u32.totalorder %s607_s29, %s602_s4 }
  0x37   : > { %p605_p6 = pnand %p603_p1, %p574_p3  ;;  %p611_p7 = scmp.lt.u32.totalorder %s602_s4, %s866_s18 }
  0x38   : > { %p610_p4 = por %p609_p5, %p608_p2 }
  0x39   : > { %p606_p13 = pneg %p605_p6 }
  0x3a   : > { %p612_p10 = por %p611_p7, %p610_p4 }
  0x3c   : > { %p613_p9 = pnand %p612_p10, %p606_p13 }
  0x3e   : > { %616 = shalt.err (!%p613_p9)
}
  0x3f   : > { %s617_s26 = scalar_lea.vmem %s876_s28, 512  ;;  %s723_s16 = smov [#allocation5]  }
  0x40   : > { %p618_p11 = scmp.ne.s32.totalorder %s876_s28, %s617_s26  ;;  %s622_s20 = sshll.u32 %s723_s16, 4  ;;  %s623_s20 = int_to_ptr.vmem [resolvable:$false] %s622_s20 }
  0x41   : > { %s624_s27 = scalar_lea.vmem %s623_s20, 1024  ;;  %p625_p8 = scmp.lt.s32.totalorder %s876_s28, %s623_s20 }
  0x42   : > { %p620_p1 = pnand %p618_p11, %p574_p3  ;;  %p626_p2 = scmp.lt.s32.totalorder %s624_s27, %s617_s26 }
  0x44   : > { %p621_p6 = pneg %p620_p1  ;;  %p627_p5 = por %p626_p2, %p625_p8 }
  0x46   : > { %p628_p4 = pnand %p627_p5, %p621_p6 }
  0x48   : > { %631 = shalt.err (!%p628_p4)
}
  0x49   : > { %488 = dma.hbm_to_vmem [thread:$0]  (!%p824_p0), %s866_s18, 512, %s876_s28, %s156_s30, %s721_s7, %s721_s7, %s722_s8  }
  0x4a   : > { %179 = sbr.rel (%p870_p12) target bundleno = 132 (0x84), region = 28  ;;  %s910_s4 = sand.u32 (!%p870_p12), 1, %s702_s10  }
  0x4b   : > { %s467_s6 = sshll.u32 (!%p870_p12), %s910_s4, 5  ;;  %s182_s29 = scalar_lea.sflag (!%p870_p12), [#allocation3], %s910_s4 }
  0x4c   : > { %s185_s5 = scalar_lea.vmem (!%p870_p12), [#allocation2], %s467_s6  ;;  %p1023_p8 = scmp.ne.s32.totalorder (!%p870_p12), %s1017_s21, 0 }
  0x51   : > { %685 = dma.done.wait (%p1023_p8), %s182_s29, 512  }
  0x52   : > { %687 = vsyncadd (%p1023_p8), %s182_s29, 4294966784  ;;  %s191_s25 = scalar_lea.sflag [#allocation6], %s910_s4  ;;  %s194_s7 = scalar_lea.vmem [#allocation5], %s467_s6 }
  0x53   : > { %689 = dma.done.wait (%p1023_p8), %s191_s25, 512  }
  0x54   : > { %691 = vsyncadd (%p1023_p8), %s191_s25, 4294966784  ;;  %v233_v0 = vld [vmem:[%s185_s5] sm:$0xff]  ;;  %v234_v1 = vld [vmem:[%s185_s5 + $0x8] sm:$0xff]  ;;  %s474_s8 = smul.u32 40, %s910_s4  ;;  %s337_s15 = scalar_lea.sflag [#allocation4], %s910_s4 }
  0x55   : > { %v235_v2 = vld [vmem:[%s185_s5 + $0x10] sm:$0xff]  ;;  %v236_v3 = vld [vmem:[%s185_s5 + $0x18] sm:$0xff]  ;;  %v923_v4 = vld [vmem:[%s194_s7] sm:$0xff]  ;;  %v241_v6 = vmul.f32 0.5, %v233_v0  ;;  %v242_v7 = vmul.f32 0.5, %v234_v1  ;;  %s475_s18 = smul.u32 640, %s710_s12 }
  0x56   : > { %v925_v5 = vld [vmem:[%s194_s7 + $0x8] sm:$0xff]  ;;  %v243_v8 = vmul.f32 0.5, %v235_v2  ;;  %v928_v9 = vld [vmem:[%s194_s7 + $0x10] sm:$0xff]  ;;  %v244_v10 = vmul.f32 0.5, %v236_v3  ;;  %v257_v12 = vmax.f32 %v233_v0, 1e-09 }
  0x57   : > { %v307_v11 = vadd.f32 %v925_v5, %v923_v4  ;;  %548 = vtanh.f32 %v241_v6  ;;  %v258_v13 = vmax.f32 %v234_v1, 1e-09  ;;  %v259_v14 = vmax.f32 %v235_v2, 1e-09  ;;  %v933_v18 = vld [vmem:[%s194_s7 + $0x18] sm:$0xff]  ;;  %s936_s21 = scalar_lea.vmem [#allocation7], %s474_s8  ;;  %s959_s3 = scalar_lea.hbm %s1013_s2, %s475_s18 }
  0x58   : > { %v260_v15 = vmax.f32 %v236_v3, 1e-09  ;;  %550 = vtanh.f32 %v242_v7  ;;  %v261_v17 = vmin.f32 %v257_v12, 1.0  ;;  %v277_v42 = vsub.f32 1.0, %v923_v4  ;;  %s350_s19 = sshll.u32 %s936_s21, 4  ;;  %p1024_p3 = scmp.ne.s32.totalorder %s1018_s22, 0  ;;  %s961_s19 = int_to_ptr.vmem [resolvable:$true] %s350_s19 }
  0x59   : > { %v308_v16 = vadd.f32 %v307_v11, %v928_v9  ;;  %552 = vtanh.f32 %v243_v8  ;;  %v262_v19 = vmin.f32 %v258_v13, 1.0  ;;  %v263_v20 = vmin.f32 %v259_v14, 1.0  ;;  %s632_s26 = scalar_lea.vmem %s961_s19, 640  ;;  %s724_s12 = smov [#allocation7]  }
  0x5a   : > { %554 = vtanh.f32 %v244_v10  ;;  %v264_v22 = vmin.f32 %v260_v15, 1.0  ;;  %v281_v23 = vsub.f32 1.0, %v261_v17  ;;  %v278_v52 = vsub.f32 1.0, %v925_v5  ;;  %p633_p0 = scmp.ne.s32.totalorder %s961_s19, %s632_s26  ;;  %s636_s16 = sshll.u32 %s724_s12, 4  ;;  %s637_s16 = int_to_ptr.vmem [resolvable:$false] %s636_s16 }
  0x5b   : > { %v309_v21 = vadd.f32 %v308_v16, %v933_v18  ;;  %556 = vlog2.f32 %v261_v17  ;;  %v282_v24 = vsub.f32 1.0, %v262_v19  ;;  %v283_v25 = vsub.f32 1.0, %v263_v20  ;;  %s638_s20 = scalar_lea.vmem %s637_s16, 1280  ;;  %p639_p7 = scmp.lt.s32.totalorder %s961_s19, %s637_s16 }
  0x5c   : > { %558 = vlog2.f32 %v262_v19  ;;  %v284_v26 = vsub.f32 1.0, %v264_v22  ;;  %v279_v61 = vsub.f32 1.0, %v928_v9  ;;  %v280_v2 = vsub.f32 1.0, %v933_v18  ;;  %p634_p12 = pnand %p633_p0, %p1024_p3  ;;  %p640_p10 = scmp.lt.s32.totalorder %s638_s20, %s632_s26 }
  0x5d   : > { %560 = vlog2.f32 %v263_v20  ;;  %329 = vst [vmem:[%s936_s21 + $0x10] sm:$0xff] %v309_v21 }
  0x5e   : > { %562 = vlog2.f32 %v264_v22  ;;  %p635_p13 = pneg %p634_p12  ;;  %p641_p9 = por %p640_p10, %p639_p7 }
  0x5f   : > { %564 = vlog2.f32 %v281_v23 }
  0x60   : > { %566 = vlog2.f32 %v282_v24  ;;  %p642_p11 = pnand %p641_p9, %p635_p13 }
  0x61   : > { %v549_v27 = vpop.eup %548  ;;  %568 = vlog2.f32 %v283_v25 }
  0x62   : > { %v551_v28 = vpop.eup %550  ;;  %v249_v29 = vmul.f32 0.5, %v549_v27  ;;  %570 = vlog2.f32 %v284_v26 }
  0x63   : > { %v553_v30 = vpop.eup %552  ;;  %v250_v31 = vmul.f32 0.5, %v551_v28 }
  0x64   : > { %v555_v32 = vpop.eup %554  ;;  %v251_v33 = vmul.f32 0.5, %v553_v30  ;;  %v253_v34 = vadd.f32 0.5, %v249_v29 }
  0x65   : > { %v557_v35 = vpop.eup %556  ;;  %v252_v36 = vmul.f32 0.5, %v555_v32  ;;  %v254_v37 = vadd.f32 0.5, %v250_v31 }
  0x66   : > { %v559_v38 = vpop.eup %558  ;;  %v255_v39 = vadd.f32 0.5, %v251_v33  ;;  %v297_v40 = vmul.f32 %v253_v34, %v923_v4  ;;  %v266_v41 = vmul.f32 0.6931472, %v557_v35 }
  0x67   : > { %v561_v43 = vpop.eup %560  ;;  %v256_v44 = vadd.f32 0.5, %v252_v36  ;;  %v298_v45 = vmul.f32 %v254_v37, %v925_v5  ;;  %v304_v46 = vadd.f32 %v254_v37, %v253_v34  ;;  %v268_v47 = vmul.f32 0.6931472, %v559_v38 }
  0x68   : > { %v563_v48 = vpop.eup %562  ;;  %v299_v49 = vmul.f32 %v255_v39, %v928_v9  ;;  %v270_v50 = vmul.f32 0.6931472, %v561_v43  ;;  %v273_v51 = vmul.f32 %v266_v41, %v923_v4 }
  0x69   : > { %v565_v53 = vpop.eup %564  ;;  %v300_v54 = vmul.f32 %v256_v44, %v933_v18  ;;  %v301_v55 = vadd.f32 %v298_v45, %v297_v40  ;;  %v305_v56 = vadd.f32 %v304_v46, %v255_v39  ;;  %v272_v57 = vmul.f32 0.6931472, %v563_v48 }
  0x6a   : > { %v567_v58 = vpop.eup %566  ;;  %v274_v59 = vmul.f32 %v268_v47, %v925_v5  ;;  %v275_v60 = vmul.f32 %v270_v50, %v928_v9  ;;  %v286_v62 = vmul.f32 0.6931472, %v565_v53 }
  0x6b   : > { %v569_v63 = vpop.eup %568  ;;  %v302_v0 = vadd.f32 %v301_v55, %v299_v49  ;;  %v306_v1 = vadd.f32 %v305_v56, %v256_v44  ;;  %v288_v3 = vmul.f32 0.6931472, %v567_v58  ;;  %v276_v6 = vmul.f32 %v272_v57, %v933_v18 }
  0x6c   : > { %v571_v4 = vpop.eup %570  ;;  %v310_v7 = vadd.f32 %v274_v59, %v273_v51  ;;  %v290_v5 = vmul.f32 0.6931472, %v569_v63  ;;  %v293_v8 = vmul.f32 %v286_v62, %v277_v42 }
  0x6d   : > { %v303_v10 = vadd.f32 %v302_v0, %v300_v54  ;;  %v292_v9 = vmul.f32 0.6931472, %v571_v4  ;;  %v294_v11 = vmul.f32 %v288_v3, %v278_v52  ;;  %326 = vst [vmem:[%s936_s21 + $0x8] sm:$0xff] %v306_v1 }
  0x6e   : > { %v311_v12 = vadd.f32 %v310_v7, %v275_v60  ;;  %v295_v13 = vmul.f32 %v290_v5, %v279_v61 }
  0x6f   : > { %v296_v14 = vmul.f32 %v292_v9, %v280_v2  ;;  %v313_v15 = vadd.f32 %v294_v11, %v293_v8  ;;  %323 = vst [vmem:[%s936_s21] sm:$0xff] %v303_v10 }
  0x70   : > { %v312_v16 = vadd.f32 %v311_v12, %v276_v6 }
  0x71   : > { %v314_v17 = vadd.f32 %v313_v15, %v295_v13 }
  0x72   : > { %332 = vst [vmem:[%s936_s21 + $0x18] sm:$0xff] %v312_v16 }
  0x73   : > { %v315_v18 = vadd.f32 %v314_v17, %v296_v14 }
  0x75   : > { %335 = vst [vmem:[%s936_s21 + $0x20] sm:$0xff] %v315_v18 }
  0x76   : > { %645 = shalt.err (!%p642_p11)
}
  0x77   : > { %s646_s27 = scalar_lea.hbm %s959_s3, 640  ;;  %s650_s5 = scalar_lea.hbm %s1013_s2, 1280 }
  0x78   : > { %p647_p1 = scmp.ne.s32.totalorder %s959_s3, %s646_s27  ;;  %p651_p5 = scmp.lt.u32.totalorder %s959_s3, %s1013_s2 }
  0x79   : > { %p652_p4 = scmp.lt.u32.totalorder %s650_s5, %s646_s27  ;;  %p654_p0 = scmp.lt.u32.totalorder %s646_s27, %s959_s3 }
  0x7a   : > { %p648_p6 = pnand %p647_p1, %p1024_p3 }
  0x7b   : > { %p653_p8 = por %p652_p4, %p651_p5 }
  0x7c   : > { %p649_p2 = pneg %p648_p6 }
  0x7d   : > { %p655_p12 = por %p654_p0, %p653_p8 }
  0x7f   : > { %p656_p13 = pnand %p655_p12, %p649_p2 }
  0x81   : > { %659 = shalt.err (!%p656_p13)
}
  0x82   : > { %s725_s8 = smov 128   ;;  %s726_s21 = smov 8  }
  0x83   : > { %480 = dma.vmem_to_hbm [thread:$0]  (%p1024_p3), %s961_s19, 640, %s959_s3, %s337_s15, %s725_s8, %s725_s8, %s726_s21  }
  0x84 PF: > { %s365_s18 = sand.u32 1, %s698_s9   ;;  %p1025_p7 = scmp.ne.s32.totalorder %s1019_s24, 0 }
  0x85   : > { %p1026_p10 = scmp.ge.s32.totalorder %s718_s14, 2  ;;  %s366_s28 = scalar_lea.sflag [#allocation4], %s365_s18 }
  0x87   : > { %p490_p9 = pnand %p1026_p10, %p1025_p7 }
  0x89   : > { %693 = dma.done.wait (!%p490_p9), %s366_s28, 640  }
  0x8a   : > { %695 = vsyncadd (!%p490_p9), %s366_s28, 4294966656  ;;  %s21_s14 = sadd.s32 1, %s718_s14   ;;  %s1027_s9 = smov %s702_s10 }
  0x8b   : > { %p18_p11 = scmp.ge.s32.totalorder %s21_s14, 4   ;;  %s1028_s10 = smov %s706_s11 }
  0x8c   : > { %s1029_s11 = smov %s798_s23  ;;  %s1030_s12 = smov %s714_s13 }
  0x8d   : > { %s1031_s13 = smov %s1033_s17  ;;  %20 = sbr.rel (!%p18_p11) target bundleno = 8 (0x8), region = 90 }
  0x94   :  { %371 = vsyncpa [#allocation3], 1 }
  0x95   :  { %373 = vsyncpa [#allocation3 + $0x1], 1 }
  0x96   :  { %374 = vsyncpa [#allocation6], 1 }
  0x97   :  { %376 = vsyncpa [#allocation6 + $0x1], 1 }
  0x98   :  { %377 = vsyncpa [#allocation4], 1 }
  0x99   :  { %379 = vsyncpa [#allocation4 + $0x1], 1 }

</bundles_post_ra>
